<compile_context>
chip_gen: v7x
topology: tpu7x:2x2x1
jax: 0.10.0
libtpu: 0.0.40
codegen_flags: <defaults>
</compile_context>

<pallas_src>
import jax
import jax.numpy as jnp
from jax.experimental import pallas as pl
from jax.experimental.pallas import tpu as pltpu


def _round_up(x, m):
    return ((x + m - 1) // m) * m


def _hipp_head_kernel(x_ref, w1_ref, b1_ref, w2_ref, b2_ref, o_ref, acc_ref):
    """One (batch-tile i, time-step t) grid step.

    x_ref  : (tb, D)      = input_embd[t, i*tb:(i+1)*tb, :]   (transpose fused)
    w1_ref : (D, H_pad)   = W1[t*D:(t+1)*D, :]
    acc_ref: (tb, H_pad)  f32 accumulator (first matmul)
    Epilogue at last t: bias1 + ReLU + second matmul + bias2 -> o_ref (tb, O_pad).
    """
    t = pl.program_id(1)

    @pl.when(t == 0)
    def _():
        acc_ref[...] = jnp.zeros_like(acc_ref)

    acc_ref[...] += jnp.dot(x_ref[...], w1_ref[...],
                            preferred_element_type=jnp.float32)

    @pl.when(t == pl.num_programs(1) - 1)
    def _():
        h = jnp.maximum(acc_ref[...] + b1_ref[...], 0.0)        # bias + ReLU (f32)
        y = jnp.dot(h.astype(w2_ref.dtype), w2_ref[...],
                    preferred_element_type=jnp.float32) + b2_ref[...]
        o_ref[...] = y.astype(o_ref.dtype)


def hipp_mlp_head_forward(input_embd, w1, b1, w2, b2, *,
                          compute_dtype=None, batch_tile=128):
    """HippMLPHead forward.

    input_embd: (T, B, D). Equivalent to:
        x = transpose(input_embd, (1,0,2)).reshape(B, T*D)
        y = relu(x @ w1 + b1) @ w2 + b2
    The transpose/reshape never materializes: the kernel reads (t, batch-tile)
    slabs of input_embd directly and uses T as the K-reduction grid axis.
    """
    T, B, D = input_embd.shape
    F_in = T * D
    hidden = w1.shape[1]
    out_dim = w2.shape[1]
    assert w1.shape == (F_in, hidden)
    assert b1.shape == (hidden,)
    assert w2.shape == (hidden, out_dim)
    assert b2.shape == (out_dim,)
    # W1 block is (D, H_pad): D sits on the sublane (second-minor) axis.
    assert D % 8 == 0, "embed dim D must be a multiple of 8"
    # TODO(synk): pad D when it is not sublane-aligned.

    cdt = jnp.dtype(compute_dtype) if compute_dtype is not None else input_embd.dtype
    out_dtype = input_embd.dtype

    # Lane-dense padding for hidden/out (multiples of 128), sublane-dense batch.
    H_pad = _round_up(hidden, 128)
    O_pad = _round_up(out_dim, 128)
    if B <= batch_tile:
        tb = _round_up(B, 8)
        B_pad = tb
    else:
        tb = batch_tile
        B_pad = _round_up(B, tb)
    num_b_tiles = B_pad // tb

    x_p = input_embd
    if B_pad != B:
        x_p = jnp.pad(x_p, ((0, 0), (0, B_pad - B), (0, 0)))
    x_p = x_p.astype(cdt)

    w1_p = jnp.pad(w1, ((0, 0), (0, H_pad - hidden))).astype(cdt)
    w2_p = jnp.pad(w2, ((0, H_pad - hidden), (0, O_pad - out_dim))).astype(cdt)
    b1_p = jnp.pad(b1, (0, H_pad - hidden)).reshape(1, H_pad).astype(jnp.float32)
    b2_p = jnp.pad(b2, (0, O_pad - out_dim)).reshape(1, O_pad).astype(jnp.float32)

    itemsize = jnp.dtype(cdt).itemsize
    out_itemsize = jnp.dtype(out_dtype).itemsize
    # Conservative VMEM budget: double-buffered inputs + f32 accumulator + output.
    vmem_est = (2 * (tb * D + D * H_pad + H_pad * O_pad) * itemsize
                + 2 * (H_pad + O_pad) * 4
                + tb * H_pad * 4
                + 2 * tb * O_pad * out_itemsize)
    vmem_limit = int(min(64 * 1024 * 1024,
                         max(2 * vmem_est + (1 << 20), 32 * 1024 * 1024)))

    cost = pl.CostEstimate(
        flops=2 * B_pad * F_in * H_pad + 2 * B_pad * H_pad * O_pad,
        transcendentals=0,
        bytes_accessed=int(x_p.size * itemsize
                           + w1_p.size * itemsize
                           + num_b_tiles * w2_p.size * itemsize
                           + B_pad * O_pad * out_itemsize),
    )

    out = pl.pallas_call(
        _hipp_head_kernel,
        out_shape=jax.ShapeDtypeStruct((B_pad, O_pad), out_dtype),
        grid=(num_b_tiles, T),
        in_specs=[
            # input_embd (T, B_pad, D): time-step t, batch tile i -> (tb, D).
            pl.BlockSpec((pl.Squeezed(), tb, D), lambda i, t: (t, i, 0)),
            # W1 rows for time-step t: W1[t*D:(t+1)*D, :].
            pl.BlockSpec((D, H_pad), lambda i, t: (t, 0)),
            pl.BlockSpec((1, H_pad), lambda i, t: (0, 0)),
            pl.BlockSpec((H_pad, O_pad), lambda i, t: (0, 0)),
            pl.BlockSpec((1, O_pad), lambda i, t: (0, 0)),
        ],
        out_specs=pl.BlockSpec((tb, O_pad), lambda i, t: (i, 0)),
        scratch_shapes=[pltpu.VMEM((tb, H_pad), jnp.float32)],
        compiler_params=pltpu.CompilerParams(
            dimension_semantics=("parallel", "arbitrary"),
            vmem_limit_bytes=vmem_limit),
        cost_estimate=cost,
    )(x_p, w1_p, b1_p, w2_p, b2_p)

    return out[:B, :out_dim]


def _init_params(key, f_in, hidden, out_dim, dtype=jnp.float32):
    """Deterministic kaiming-style init (matches init_weights('kaiming') intent)."""
    k1, k2 = jax.random.split(key)
    w1 = jax.random.normal(k1, (f_in, hidden), dtype) * jnp.sqrt(2.0 / f_in)
    b1 = jnp.zeros((hidden,), dtype)
    w2 = jax.random.normal(k2, (hidden, out_dim), dtype) * jnp.sqrt(2.0 / hidden)
    b2 = jnp.zeros((out_dim,), dtype)
    return w1, b1, w2, b2


def _reference(input_embd, w1, b1, w2, b2):
    T, B, D = input_embd.shape
    x = jnp.transpose(input_embd, (1, 0, 2)).reshape(B, T * D)
    h = jnp.maximum(x @ w1 + b1, 0.0)
    return h @ w2 + b2


if __name__ == "__main__":
    # Small shapes: seq T=8, batch B=2, embed dim D=32 -> flattened 256 features.
    T, B, D = 8, 2, 32
    hidden, out_dim = 64, 32

    key = jax.random.PRNGKey(0)
    k_x, k_p = jax.random.split(key)
    input_embd = jax.random.normal(k_x, (T, B, D), jnp.float32)
    w1, b1, w2, b2 = _init_params(k_p, T * D, hidden, out_dim)

    ref = _reference(input_embd, w1, b1, w2, b2)

    # f32 path: exact vs reference.
    out = hipp_mlp_head_forward(input_embd, w1, b1, w2, b2)
    out = jax.block_until_ready(out)
    assert out.shape == (B, out_dim)
    assert jnp.allclose(out, ref, atol=1e-5, rtol=1e-5), "f32 mismatch vs reference"

    # bf16 MXU path (f32 accumulation): looser tolerance as expected for bf16 inputs.
    out_bf16 = hipp_mlp_head_forward(input_embd, w1, b1, w2, b2,
                                     compute_dtype=jnp.bfloat16)
    out_bf16 = jax.block_until_ready(out_bf16)
    assert out_bf16.shape == (B, out_dim)
    assert jnp.allclose(out_bf16.astype(jnp.float32), ref, atol=1e-1, rtol=5e-2), \
        "bf16 mismatch vs reference"

    print("KERNEL_OK")
</pallas_src>

<mosaic_0001>
module attributes {stable_mosaic.version = 11 : i64} {
  func.func @_hipp_head_kernel(%arg0: i32, %arg1: i32, %arg2: memref<1x8x32xf32, #tpu.memory_space<vmem>>, %arg3: memref<32x128xf32, #tpu.memory_space<vmem>>, %arg4: memref<1x128xf32, #tpu.memory_space<vmem>>, %arg5: memref<128x128xf32, #tpu.memory_space<vmem>>, %arg6: memref<1x128xf32, #tpu.memory_space<vmem>>, %arg7: memref<8x128xf32, #tpu.memory_space<vmem>>, %arg8: memref<8x128xf32, #tpu.memory_space<vmem>>) attributes {dimension_semantics = [#tpu.dimension_semantics<parallel>, #tpu.dimension_semantics<arbitrary>], iteration_bounds = array<i64: 1, 8>, scalar_prefetch = 0 : i64, scratch_operands = 1 : i64, tpu.core_type = #tpu.core_type<tc>, window_params = [{transform_indices = @transform_0, window_bounds = array<i64: 1, 8, 32>}, {transform_indices = @transform_1, window_bounds = array<i64: 32, 128>}, {pipeline_mode = #tpu.pipeline_mode<synchronous>, transform_indices = @transform_2, window_bounds = array<i64: 1, 128>}, {pipeline_mode = #tpu.pipeline_mode<synchronous>, transform_indices = @transform_3, window_bounds = array<i64: 128, 128>}, {pipeline_mode = #tpu.pipeline_mode<synchronous>, transform_indices = @transform_4, window_bounds = array<i64: 1, 128>}, {transform_indices = @transform_5, window_bounds = array<i64: 8, 128>}]} {
    %c0_i32 = arith.constant 0 : i32
    %0 = arith.cmpi eq, %arg1, %c0_i32 : i32
    %1 = arith.extui %0 : i1 to i32
    %c0_i32_0 = arith.constant 0 : i32
    %2 = arith.cmpi ne, %1, %c0_i32_0 : i32
    scf.if %2 {
      %cst_10 = arith.constant 0.000000e+00 : f32
      %13 = vector.broadcast %cst_10 : f32 to vector<8x128xf32>
      %c0_11 = arith.constant 0 : index
      %c0_12 = arith.constant 0 : index
      %14 = vector.load %arg8[%c0_11, %c0_12] : memref<8x128xf32, #tpu.memory_space<vmem>>, vector<8x128xf32>
      tpu.vector_store %arg8[%c0_11, %c0_12], %13 {strides = array<i32>} : memref<8x128xf32, #tpu.memory_space<vmem>>, vector<8x128xf32>,
    } else {
    }
    %c0 = arith.constant 0 : index
    %c0_1 = arith.constant 0 : index
    %3 = vector.load %arg8[%c0, %c0_1] : memref<8x128xf32, #tpu.memory_space<vmem>>, vector<8x128xf32>
    %c0_2 = arith.constant 0 : index
    %c0_3 = arith.constant 0 : index
    %c0_4 = arith.constant 0 : index
    %4 = vector.load %arg2[%c0_2, %c0_3, %c0_4] : memref<1x8x32xf32, #tpu.memory_space<vmem>>, vector<1x8x32xf32>
    %5 = vector.shape_cast %4 : vector<1x8x32xf32> to vector<8x32xf32>
    %c0_5 = arith.constant 0 : index
    %c0_6 = arith.constant 0 : index
    %6 = vector.load %arg3[%c0_5, %c0_6] : memref<32x128xf32, #tpu.memory_space<vmem>>, vector<32x128xf32>
    %cst = arith.constant dense<0.000000e+00> : vector<8x128xf32>
    %7 = tpu.matmul %5, %6, %cst {dimension_numbers = #tpu.dot_dimension_numbers<[1], [0], [0], [1], [0, 0, 1, 1], [], []>} : vector<8x32xf32>, vector<32x128xf32>, vector<8x128xf32> -> vector<8x128xf32>
    %8 = arith.addf %3, %7 : vector<8x128xf32>
    %c0_7 = arith.constant 0 : index
    %c0_8 = arith.constant 0 : index
    %9 = vector.load %arg8[%c0_7, %c0_8] : memref<8x128xf32, #tpu.memory_space<vmem>>, vector<8x128xf32>
    tpu.vector_store %arg8[%c0_7, %c0_8], %8 {strides = array<i32>} : memref<8x128xf32, #tpu.memory_space<vmem>>, vector<8x128xf32>,
    %c7_i32 = arith.constant 7 : i32
    %10 = arith.cmpi eq, %arg1, %c7_i32 : i32
    %11 = arith.extui %10 : i1 to i32
    %c0_i32_9 = arith.constant 0 : i32
    %12 = arith.cmpi ne, %11, %c0_i32_9 : i32
    scf.if %12 {
      %c0_10 = arith.constant 0 : index
      %c0_11 = arith.constant 0 : index
      %13 = vector.load %arg8[%c0_10, %c0_11] : memref<8x128xf32, #tpu.memory_space<vmem>>, vector<8x128xf32>
      %c0_12 = arith.constant 0 : index
      %c0_13 = arith.constant 0 : index
      %14 = vector.load %arg4[%c0_12, %c0_13] : memref<1x128xf32, #tpu.memory_space<vmem>>, vector<1x128xf32>
      %15 = vector.broadcast %14 : vector<1x128xf32> to vector<8x128xf32>
      %16 = arith.addf %13, %15 : vector<8x128xf32>
      %cst_14 = arith.constant 0.000000e+00 : f32
      %17 = vector.broadcast %cst_14 : f32 to vector<8x128xf32>
      %18 = arith.maximumf %16, %17 : vector<8x128xf32>
      %c0_15 = arith.constant 0 : index
      %c0_16 = arith.constant 0 : index
      %19 = vector.load %arg5[%c0_15, %c0_16] : memref<128x128xf32, #tpu.memory_space<vmem>>, vector<128x128xf32>
      %cst_17 = arith.constant dense<0.000000e+00> : vector<8x128xf32>
      %20 = tpu.matmul %18, %19, %cst_17 {dimension_numbers = #tpu.dot_dimension_numbers<[1], [0], [0], [1], [0, 0, 1, 1], [], []>} : vector<8x128xf32>, vector<128x128xf32>, vector<8x128xf32> -> vector<8x128xf32>
      %c0_18 = arith.constant 0 : index
      %c0_19 = arith.constant 0 : index
      %21 = vector.load %arg6[%c0_18, %c0_19] : memref<1x128xf32, #tpu.memory_space<vmem>>, vector<1x128xf32>
      %22 = vector.broadcast %21 : vector<1x128xf32> to vector<8x128xf32>
      %23 = arith.addf %20, %22 : vector<8x128xf32>
      %c0_20 = arith.constant 0 : index
      %c0_21 = arith.constant 0 : index
      %24 = vector.load %arg7[%c0_20, %c0_21] : memref<8x128xf32, #tpu.memory_space<vmem>>, vector<8x128xf32>
      tpu.vector_store %arg7[%c0_20, %c0_21], %23 {strides = array<i32>} : memref<8x128xf32, #tpu.memory_space<vmem>>, vector<8x128xf32>,
    } else {
    }
    return
  }
  func.func @transform_0(%arg0: i32, %arg1: i32) -> (i32, i32, i32) {
    %c0_i32 = arith.constant 0 : i32
    %c0_i32_0 = arith.constant 0 : i32
    return %arg1, %arg0, %c0_i32 : i32, i32, i32
  }
  func.func @transform_1(%arg0: i32, %arg1: i32) -> (i32, i32) {
    %c0_i32 = arith.constant 0 : i32
    %c0_i32_0 = arith.constant 0 : i32
    return %arg1, %c0_i32 : i32, i32
  }
  func.func @transform_2(%arg0: i32, %arg1: i32) -> (i32, i32) {
    %c0_i32 = arith.constant 0 : i32
    %c0_i32_0 = arith.constant 0 : i32
    %c0_i32_1 = arith.constant 0 : i32
    return %c0_i32, %c0_i32_0 : i32, i32
  }
  func.func @transform_3(%arg0: i32, %arg1: i32) -> (i32, i32) {
    %c0_i32 = arith.constant 0 : i32
    %c0_i32_0 = arith.constant 0 : i32
    %c0_i32_1 = arith.constant 0 : i32
    return %c0_i32, %c0_i32_0 : i32, i32
  }
  func.func @transform_4(%arg0: i32, %arg1: i32) -> (i32, i32) {
    %c0_i32 = arith.constant 0 : i32
    %c0_i32_0 = arith.constant 0 : i32
    %c0_i32_1 = arith.constant 0 : i32
    return %c0_i32, %c0_i32_0 : i32, i32
  }
  func.func @transform_5(%arg0: i32, %arg1: i32) -> (i32, i32) {
    %c0_i32 = arith.constant 0 : i32
    %c0_i32_0 = arith.constant 0 : i32
    return %arg0, %c0_i32 : i32, i32
  }
}

</mosaic_0001>

<bundles_post_ra>
// kernel: tpu_custom_call.1
= control target key start
LH: loop header
LB: loop body
LE: loop exit
PB: predicated region body
PF: predicated region fallthrough
CT: control target
= control target key end

     0   :  { %10 = vsyncpa [#allocation4], 0  ;;  %s1263_s0 = inlined_call_operand.hbm [shape: f32[8,8,32], index: 0, kind: input, shape index: {}]   ;;  %s1264_s1 = inlined_call_operand.hbm [shape: f32[256,128], index: 1, kind: input, shape index: {}]   ;;  %s1265_s2 = inlined_call_operand.vmem [shape: f32[1,128], index: 2, kind: input, shape index: {}]   ;;  %s1266_s3 = inlined_call_operand.hbm [shape: f32[128,128], index: 3, kind: input, shape index: {}]   ;;  %s1267_s4 = inlined_call_operand.vmem [shape: f32[1,128], index: 4, kind: input, shape index: {}]   ;;  %s1268_s5 = inlined_call_operand.hbm [shape: f32[8,128], index: 5, kind: output, shape index: {}]  }
   0x1   :  { %12 = vsyncpa [#allocation4 + $0x1], 0 }
   0x2   :  { %13 = vsyncpa [#allocation7], 0 }
   0x3   :  { %15 = vsyncpa [#allocation7 + $0x1], 0 }
   0x4   :  { %16 = vsyncpa [#allocation5], 0  ;;  %s1030_s18 = smov 0   ;;  %s1032_s19 = smov 0  }
   0x5   :  { %s1034_s20 = smov 0   ;;  %s1036_s21 = smov 0  }
   0x6   :  { %s1038_s22 = smov 0   ;;  %s1040_s23 = smov 0  }
   0x7 LB: > { %s1059_s24 = sadd.s32 4294967295, %s985_s23   ;;  %p56_p0 = scmp.ne.s32.totalorder %s969_s19, %s965_s18  ;;  %s985_s23 = sphi %s1040_s23, %s22_s23   ;;  %s981_s22 = sphi %s1038_s22, %s1288_s22   ;;  %s977_s21 = sphi %s1036_s21, %s1287_s21   ;;  %s973_s20 = sphi %s1034_s20, %s1286_s20   ;;  %s969_s19 = sphi %s1032_s19, %s1285_s19   ;;  %s965_s18 = sphi %s1030_s18, %s1284_s18  }
   0x8   : > { %p1269_p1 = scmp.eq.s32.totalorder %s1059_s24, 0  ;;  %p602_p2 = scmp.ge.s32.totalorder %s985_s23, 1 }
   0x9   : > { %p182_p3 = scmp.lt.s32.totalorder %s985_s23, 9  ;;  %s987_s27 = smov [#allocation8]  }
   0xa   : > { %p1067_p4 = por %p1269_p1, %p56_p0  ;;  %s197_s28 = sshll.u32 %s987_s27, 4  ;;  %s198_s28 = int_to_ptr.vmem [resolvable:$true] %s197_s28 }
   0xb   : > { %p1071_p5 = pnand %p602_p2, %p182_p3  ;;  %s31_s30 = sadd.s32 1, %s981_s22 }
   0xc   : > { %s1274_s25 = scalar_select %p1067_p4, 1, 0 }
   0xd   : > { %s1275_s26 = scalar_select %p1071_p5, 1, 0 }
   0xe   : > { %p734_p6 = pneg %p1071_p5  ;;  %s809_s8 = scalar_lea.hbm %s1266_s3, 2048 }
   0xf   : > { %p810_p8 = scmp.ne.s32.totalorder %s1266_s3, %s809_s8  ;;  %p816_p12 = scmp.lt.u32.totalorder %s809_s8, %s1266_s3 }
  0x10   : > { %p1079_p7 = pnand %p734_p6, %p1269_p1 }
  0x12   : > { %p811_p9 = pneg %p1079_p7 }
  0x14   : > { %p812_p10 = pnand %p811_p9, %p810_p8 }
  0x16   : > { %p813_p11 = pneg %p812_p10 }
  0x18   : > { %p818_p13 = pnand %p816_p12, %p813_p11 }
  0x1a   : > { %821 = shalt.err (!%p818_p13)
}
  0x1b   : > { %s822_s13 = scalar_lea.vmem %s198_s28, 2048  ;;  %p830_p6 = scmp.lt.s32.totalorder %s198_s28, %s198_s28 }
  0x1c   : > { %p823_p0 = scmp.ne.s32.totalorder %s198_s28, %s822_s13  ;;  %p831_p1 = scmp.lt.s32.totalorder %s822_s13, %s822_s13 }
  0x1e   : > { %p825_p2 = pnand %p823_p0, %p811_p9  ;;  %p832_p4 = por %p831_p1, %p830_p6 }
  0x20   : > { %p826_p3 = pneg %p825_p2 }
  0x22   : > { %p833_p5 = pnand %p832_p4, %p826_p3 }
  0x24   : > { %836 = shalt.err (!%p833_p5)
}
  0x25   : > { %s1272_s14 = smov 128   ;;  %s1273_s15 = smov 8  }
  0x26   : > { %737 = dma.hbm_to_vmem [thread:$0]  (!%p1079_p7), %s1266_s3, 2048, %s198_s28, [#allocation7], %s1272_s14, %s1272_s14, %s1273_s15  }
  0x27   : > { %p32_p1 = scmp.ge.s32.totalorder %s31_s30, 8  ;;  %s43_s18 = sadd.s32 1, %s973_s20 }
  0x28   : > { %p50_p4 = scmp.ne.s32.totalorder %s973_s20, %s969_s19  ;;  %p51_p5 = scmp.eq.s32.totalorder %s985_s23, 0 }
  0x29   : > { %s1290_s30 = smov (%p32_p1, %s31_s30), 0  ;;  %p746_p9 = scmp.lt.s32.totalorder %s985_s23, 8 }
  0x2a   : > { %p52_p8 = por %p51_p5, %p50_p4  ;;  %s38_s27 = ssub.s32 %s981_s22, %s1290_s30 }
  0x2b   : > { %s1113_s6 = sand.u32 1, %s973_s20   ;;  %p41_p10 = scmp.eq.s32.totalorder %s38_s27, 0 }
  0x2c   : > { %s605_s29 = sshll.u32 %s1113_s6, 3  ;;  %s606_s7 = sshll.u32 %s981_s22, 7 }
  0x2d   : > { %s1118_s8 = scalar_select %p41_p10, %s973_s20, %s43_s18  }
  0x2e   : > { %s1123_s10 = scalar_lea.hbm %s1263_s0, %s606_s7  ;;  %s218_s11 = scalar_lea.vmem [#allocation3], %s605_s29 }
  0x2f   : > { %s226_s12 = sshll.u32 %s218_s11, 4  ;;  %p1125_p7 = pnand %p746_p9, %p52_p8  ;;  %s1129_s12 = int_to_ptr.vmem [resolvable:$true] %s226_s12 }
  0x30   : > { %s607_s16 = sshll.u32 %s1113_s6, 5  ;;  %s215_s17 = scalar_lea.sflag [#allocation4], %s1113_s6 }
  0x31   : > { %s837_s18 = scalar_lea.hbm %s1123_s10, 128  ;;  %p839_p12 = pneg %p1125_p7 }
  0x32   : > { %p838_p11 = scmp.ne.s32.totalorder %s1123_s10, %s837_s18  ;;  %s842_s7 = scalar_lea.hbm %s1263_s0, 1024 }
  0x33   : > { %p843_p2 = scmp.lt.u32.totalorder %s1123_s10, %s1263_s0  ;;  %p844_p3 = scmp.lt.u32.totalorder %s842_s7, %s837_s18 }
  0x34   : > { %p840_p13 = pnand %p839_p12, %p838_p11  ;;  %p846_p1 = scmp.lt.u32.totalorder %s837_s18, %s1123_s10 }
  0x35   : > { %p845_p6 = por %p844_p3, %p843_p2 }
  0x36   : > { %p841_p0 = pneg %p840_p13 }
  0x37   : > { %p847_p4 = por %p846_p1, %p845_p6 }
  0x39   : > { %p848_p5 = pnand %p847_p4, %p841_p0 }
  0x3b   : > { %851 = shalt.err (!%p848_p5)
}
  0x3c   : > { %s852_s11 = scalar_lea.vmem %s1129_s12, 128  ;;  %s990_s27 = smov [#allocation3]  }
  0x3d   : > { %p853_p8 = scmp.ne.s32.totalorder %s1129_s12, %s852_s11  ;;  %s857_s29 = sshll.u32 %s990_s27, 4  ;;  %s858_s29 = int_to_ptr.vmem [resolvable:$false] %s857_s29 }
  0x3e   : > { %s859_s28 = scalar_lea.vmem %s858_s29, 256  ;;  %p860_p11 = scmp.lt.s32.totalorder %s1129_s12, %s858_s29 }
  0x3f   : > { %p855_p9 = pnand %p853_p8, %p839_p12  ;;  %p861_p13 = scmp.lt.s32.totalorder %s859_s28, %s852_s11 }
  0x41   : > { %p856_p10 = pneg %p855_p9  ;;  %p862_p2 = por %p861_p13, %p860_p11 }
  0x43   : > { %p863_p3 = pnand %p862_p2, %p856_p10 }
  0x45   : > { %866 = shalt.err (!%p863_p3)
}
  0x46   : > { %741 = dma.hbm_to_vmem [thread:$0]  (!%p1125_p7), %s1123_s10, 128, %s1129_s12, %s215_s17  }
  0x47   : > { %s623_s18 = sshll.u32 %s981_s22, 9  ;;  %s237_s7 = scalar_lea.vmem [#allocation6], %s607_s16 }
  0x48   : > { %s244_s9 = sshll.u32 %s237_s7, 4  ;;  %s233_s27 = sand.u32 1, %s985_s23   ;;  %s1161_s9 = int_to_ptr.vmem [resolvable:$true] %s244_s9 }
  0x49   : > { %s1167_s28 = scalar_lea.hbm %s1264_s1, %s623_s18  ;;  %s1169_s14 = scalar_lea.sflag [#allocation7], %s233_s27 }
  0x4a   : > { %s867_s15 = scalar_lea.hbm %s1167_s28, 512  ;;  %s872_s12 = scalar_lea.hbm %s1264_s1, 4096 }
  0x4b   : > { %p868_p0 = scmp.ne.s32.totalorder %s1167_s28, %s867_s15  ;;  %p873_p4 = scmp.lt.u32.totalorder %s1167_s28, %s1264_s1 }
  0x4c   : > { %p874_p5 = scmp.lt.u32.totalorder %s872_s12, %s867_s15  ;;  %p876_p9 = scmp.lt.u32.totalorder %s867_s15, %s1167_s28 }
  0x4d   : > { %p870_p6 = pnand %p868_p0, %p839_p12 }
  0x4e   : > { %p875_p8 = por %p874_p5, %p873_p4 }
  0x4f   : > { %p871_p1 = pneg %p870_p6 }
  0x50   : > { %p877_p10 = por %p876_p9, %p875_p8 }
  0x52   : > { %p878_p11 = pnand %p877_p10, %p871_p1 }
  0x54   : > { %881 = shalt.err (!%p878_p11)
}
  0x55   : > { %s882_s18 = scalar_lea.vmem %s1161_s9, 512  ;;  %s991_s7 = smov [#allocation6]  }
  0x56   : > { %p883_p13 = scmp.ne.s32.totalorder %s1161_s9, %s882_s18  ;;  %s887_s27 = sshll.u32 %s991_s7, 4  ;;  %s888_s27 = int_to_ptr.vmem [resolvable:$false] %s887_s27 }
  0x57   : > { %s889_s11 = scalar_lea.vmem %s888_s27, 1024  ;;  %p890_p0 = scmp.lt.s32.totalorder %s1161_s9, %s888_s27 }
  0x58   : > { %p885_p2 = pnand %p883_p13, %p839_p12  ;;  %p891_p6 = scmp.lt.s32.totalorder %s889_s11, %s882_s18 }
  0x5a   : > { %p886_p3 = pneg %p885_p2  ;;  %p892_p4 = por %p891_p6, %p890_p0 }
  0x5c   : > { %p893_p5 = pnand %p892_p4, %p886_p3 }
  0x5e   : > { %896 = shalt.err (!%p893_p5)
}
  0x5f   : > { %s1278_s15 = smov 8   ;;  %s1279_s29 = smov 128  }
  0x60   : > { %744 = dma.hbm_to_vmem [thread:$0]  (!%p1125_p7), %s1167_s28, 512, %s1161_s9, %s1169_s14, %s1279_s29, %s1279_s29, %s1278_s15  }
  0x61   : > { %p1280_p12 = scmp.ne.s32.totalorder %s1275_s26, 0 }
  0x62   : > { %s258_s6 = sand.u32 (!%p1280_p12), 1, %s969_s19   ;;  %p1281_p1 = scmp.ne.s32.totalorder (!%p1280_p12), %s1274_s25, 0 }
  0x63   : > { %256 = sbr.rel (%p1280_p12) target bundleno = 598 (0x256), region = 40  ;;  %s611_s10 = sshll.u32 (!%p1280_p12), %s258_s6, 3 }
  0x64   : > { %s259_s12 = scalar_lea.sflag (!%p1280_p12), [#allocation4], %s258_s6  ;;  %s262_s16 = scalar_lea.vmem (!%p1280_p12), [#allocation3], %s611_s10 }
  0x6a   : > { %948 = dma.done.wait (%p1281_p1), %s259_s12, 128  }
  0x6b   : > { %950 = vsyncadd (%p1281_p1), %s259_s12, 4294967168  ;;  %s267_s13 = sand.u32 1, %s1059_s24   ;;  %s612_s17 = sshll.u32 %s258_s6, 5 }
  0x6c   : > { %s268_s18 = scalar_lea.sflag [#allocation7], %s267_s13  ;;  %s271_s14 = scalar_lea.vmem [#allocation6], %s612_s17 }
  0x6d   : > { %952 = dma.done.wait (%p1281_p1), %s268_s18, 512  }
  0x6e   : > { %954 = vsyncadd (%p1281_p1), %s268_s18, 4294966784  ;;  %p1282_p7 = scmp.eq.s32.totalorder %s1059_s24, 0 }
  0x70   : > { %956 = dma.done.wait (%p1282_p7), [#allocation7], 2048   ;;  %p1283_p8 = pmov %p1282_p7 }
  0x71   : > { %p614_p9 = scmp.ne.s32.totalorder %s977_s21, 0 }
  0x72   : > { %958 = vsyncadd (%p1283_p8), [#allocation7], 4294965248  ;;  %v992_v0 = vmov (!%p614_p9), 0.0  }
  0x73   : > { %306 = sbr.rel (%p614_p9) target bundleno = 122 (0x7a), region = 56  ;;  %307 = vst [vmem:[#allocation2] sm:$0xff] (!%p614_p9), %v992_v0 }
  0x7a PF: > { %v310_v1 = vld [vmem:[%s271_s14] sm:$0xff]  ;;  %v311_v2 = vld [vmem:[%s271_s14 + $0x8] sm:$0xff]  ;;  %v312_v3 = vld [vmem:[%s271_s14 + $0x10] sm:$0xff]  ;;  %v993_v4 = vmov 0.0|0.0   ;;  %vm994_vm0 = vmmov 0   ;;  %v995_v7 = vmov 0.0  }
  0x7b   : > { %692 = vmatprep.subr.bf16.mxu0 %v993_v4  ;;  %v693_v5 = vpack.c.bf16 %v311_v2, %v310_v1  ;;  %v313_v6 = vld [vmem:[%s271_s14 + $0x18] sm:$0xff]  ;;  %654 = vmatprep.mubr.msk.f32.mxu0 %vm994_vm0, %v995_v7  ;;  %vm314_vm1 = vcmask 261120   ;;  %v308_v10 = vld [vmem:[#allocation2] sm:$0xff]  ;;  %p616_p10 = scmp.ne.s32.totalorder %s977_s21, 7 }
  0x7c   : > { %v696_v8 = vpack.c.bf16 %v313_v6, %v312_v3  ;;  %v309_v9 = vld [vmem:[%s262_s16] sm:$0xff]  ;;  %v404_v14 = vld [vmem:[#allocation8] sm:$0xff] (!%p616_p10)  ;;  %v405_v15 = vld [vmem:[#allocation8 + $0x8] sm:$0xff] (!%p616_p10)  ;;  %v996_v17 = vmov (!%p616_p10), 0.0|0.0   ;;  %vm997_vm2 = vmmov (!%p616_p10), 0   ;;  %v998_v20 = vmov (!%p616_p10), 0.0  }
  0x7d   : > { %694 = vmatpush3.bf16.msra.mxu0 %v693_v5  ;;  %v406_v16 = vld [vmem:[#allocation8 + $0x10] sm:$0xff] (!%p616_p10)  ;;  %v699_v18 = vpack.c.bf16 (!%p616_p10), %v405_v15, %v404_v14  ;;  %v407_v19 = vld [vmem:[#allocation8 + $0x18] sm:$0xff] (!%p616_p10)  ;;  %v408_v22 = vld [vmem:[#allocation8 + $0x20] sm:$0xff] (!%p616_p10) }
  0x7e   : > { %695 = vmatprep.subr.bf16.mxu0 %v993_v4  ;;  %v702_v21 = vpack.c.bf16 (!%p616_p10), %v407_v19, %v406_v16  ;;  %v409_v23 = vld [vmem:[#allocation8 + $0x28] sm:$0xff] (!%p616_p10)  ;;  %v410_v25 = vld [vmem:[#allocation8 + $0x30] sm:$0xff] (!%p616_p10)  ;;  %v411_v26 = vld [vmem:[#allocation8 + $0x38] sm:$0xff] (!%p616_p10) }
  0x7f   : > { %v705_v24 = vpack.c.bf16 (!%p616_p10), %v409_v23, %v408_v22  ;;  %v708_v27 = vpack.c.bf16 (!%p616_p10), %v411_v26, %v410_v25  ;;  %v412_v28 = vld [vmem:[#allocation8 + $0x40] sm:$0xff] (!%p616_p10)  ;;  %v413_v29 = vld [vmem:[#allocation8 + $0x48] sm:$0xff] (!%p616_p10)  ;;  %v414_v31 = vld [vmem:[#allocation8 + $0x50] sm:$0xff] (!%p616_p10) }
  0x80   : > { %v711_v30 = vpack.c.bf16 (!%p616_p10), %v413_v29, %v412_v28  ;;  %v415_v32 = vld [vmem:[#allocation8 + $0x58] sm:$0xff] (!%p616_p10)  ;;  %v416_v34 = vld [vmem:[#allocation8 + $0x60] sm:$0xff] (!%p616_p10)  ;;  %v417_v35 = vld [vmem:[#allocation8 + $0x68] sm:$0xff] (!%p616_p10) }
  0x81   : > { %697 = vmatpush3.bf16.msra.mxu0 %v696_v8  ;;  %v714_v33 = vpack.c.bf16 (!%p616_p10), %v415_v32, %v414_v31  ;;  %v717_v36 = vpack.c.bf16 (!%p616_p10), %v417_v35, %v416_v34  ;;  %v617_v38 = vld [vmem:[%s1265_s2] ss:$0 sm:$0xff] (!%p616_p10)  ;;  %v418_v39 = vld [vmem:[#allocation8 + $0x70] sm:$0xff] (!%p616_p10)  ;;  %v419_v40 = vld [vmem:[#allocation8 + $0x78] sm:$0xff] (!%p616_p10) }
  0x82   : > { %698 = vmatprep.subr.bf16.mxu0 (!%p616_p10), %v996_v17  ;;  %v720_v42 = vpack.c.bf16 (!%p616_p10), %v419_v40, %v418_v39  ;;  %v618_v44 = vld [vmem:[%s1267_s4] ss:$0 sm:$0xff] (!%p616_p10) }
  0x84   : > { %655 = vmatmul.mubr.msk.f32.vlgmr.msra.gmra.mrb[0].mxu0 %vm314_vm1, %v309_v9 }
  0x85   : > { %689 = vmatprep.mubr.msk.f32.mxu0 (!%p616_p10), %vm997_vm2, %v998_v20  ;;  %700 = vmatpush3.bf16.msra.mxu0 (!%p616_p10), %v699_v18 }
  0x86   : > { %701 = vmatprep.subr.bf16.mxu0 (!%p616_p10), %v996_v17 }
  0x89   : > { %703 = vmatpush3.bf16.msra.mxu0 (!%p616_p10), %v702_v21 }
  0x8a   : > { %704 = vmatprep.subr.bf16.mxu0 (!%p616_p10), %v996_v17 }
  0x8d   : > { %706 = vmatpush3.bf16.msra.mxu0 (!%p616_p10), %v705_v24 }
  0x8e   : > { %707 = vmatprep.subr.bf16.mxu0 (!%p616_p10), %v996_v17 }
  0x91   : > { %709 = vmatpush3.bf16.msra.mxu0 (!%p616_p10), %v708_v27 }
  0x92   : > { %710 = vmatprep.subr.bf16.mxu0 (!%p616_p10), %v996_v17 }
  0x95   : > { %712 = vmatpush3.bf16.msra.mxu0 (!%p616_p10), %v711_v30 }
  0x96   : > { %713 = vmatprep.subr.bf16.mxu0 (!%p616_p10), %v996_v17 }
  0x99   : > { %715 = vmatpush3.bf16.msra.mxu0 (!%p616_p10), %v714_v33 }
  0x9a   : > { %716 = vmatprep.subr.bf16.mxu0 (!%p616_p10), %v996_v17 }
  0x9d   : > { %718 = vmatpush3.bf16.msra.mxu0 (!%p616_p10), %v717_v36 }
  0x9e   : > { %719 = vmatprep.subr.bf16.mxu0 (!%p616_p10), %v996_v17 }
  0xa1   : > { %721 = vmatpush3.bf16.msra.mxu0 (!%p616_p10), %v720_v42 }
 0x154   : > { %393 = sbr.rel (%p616_p10) target bundleno = 573 (0x23d), region = 60 }
 0x157   : > { %v384_v11 = vpop.f32.mrb[0].mxu0 }
 0x158   : > { %v388_v12 = vadd.f32 %v384_v11, %v308_v10  ;;  %v656_v13 = vpop.f32.mrb[1].mxu0 }
 0x15a   : > { %389 = vst [vmem:[#allocation2] sm:$0xff] %v388_v12 }
 0x161   : > { %v394_v37 = vld [vmem:[#allocation2] sm:$0xff] }
 0x162   : > { %v402_v41 = vadd.f32 %v617_v38, %v394_v37 }
 0x164   : > { %v403_v43 = vmax.f32 %v402_v41, 0.0 }
 0x166   : > { %690 = vmatmul.mubr.f32.vlgmr.msra.gmra.mrb[0].mxu0 %v403_v43 }
 0x239   : > { %v493_v45 = vpop.f32.mrb[0].mxu0 }
 0x23a   : > { %v494_v46 = vadd.f32 %v618_v44, %v493_v45  ;;  %v691_v47 = vpop.f32.mrb[1].mxu0 }
 0x23c   : > { %497 = vst [vmem:[#allocation9] sm:$0xff] %v494_v46 }
 0x23d PF: > { %p748_p11 = scmp.eq.s32.totalorder %s1059_s24, 7  ;;  %s999_s28 = smov [#allocation9]  }
 0x23e   : > { %s507_s7 = sshll.u32 %s999_s28, 4  ;;  %s508_s7 = int_to_ptr.vmem [resolvable:$true] %s507_s7 }
 0x23f   : > { %s897_s27 = scalar_lea.vmem %s508_s7, 128  ;;  %p904_p0 = scmp.lt.s32.totalorder %s508_s7, %s508_s7 }
 0x240   : > { %p898_p13 = scmp.ne.s32.totalorder %s508_s7, %s897_s27  ;;  %p905_p6 = scmp.lt.s32.totalorder %s897_s27, %s897_s27 }
 0x242   : > { %p899_p2 = pnand %p898_p13, %p748_p11  ;;  %p906_p4 = por %p905_p6, %p904_p0 }
 0x244   : > { %p900_p3 = pneg %p899_p2 }
 0x246   : > { %p907_p5 = pnand %p906_p4, %p900_p3 }
 0x248   : > { %910 = shalt.err (!%p907_p5)
}
 0x249   : > { %s911_s29 = scalar_lea.hbm %s1268_s5, 128 }
 0x24a   : > { %p912_p12 = scmp.ne.s32.totalorder %s1268_s5, %s911_s29  ;;  %p917_p8 = scmp.lt.u32.totalorder %s911_s29, %s1268_s5 }
 0x24c   : > { %p913_p1 = pnand %p912_p12, %p748_p11 }
 0x24e   : > { %p914_p7 = pneg %p913_p1 }
 0x250   : > { %p919_p9 = pnand %p917_p8, %p914_p7 }
 0x252   : > { %922 = shalt.err (!%p919_p9)
}
 0x253   : > { %731 = dma.vmem_to_hbm [thread:$0]  (%p748_p11), %s508_s7, 128, %s1268_s5, [#allocation5]  }
 0x254   : > { %960 = dma.done.wait (%p748_p11), [#allocation5], 128  }
 0x255   : > { %962 = vsyncadd (%p748_p11), [#allocation5], 4294967168 }
 0x256 PF: > { %s22_s23 = sadd.s32 1, %s985_s23   ;;  %s1284_s18 = smov %s969_s19 }
 0x257   : > { %p19_p10 = scmp.ge.s32.totalorder %s22_s23, 10   ;;  %s1285_s19 = smov %s973_s20 }
 0x258   : > { %s1286_s20 = smov %s1118_s8  ;;  %s1287_s21 = smov %s981_s22 }
 0x259   : > { %s1288_s22 = smov %s1290_s30  ;;  %21 = sbr.rel (!%p19_p10) target bundleno = 7 (0x7), region = 103 }
 0x260   :  { %520 = vsyncpa [#allocation4], 1 }
 0x261   :  { %522 = vsyncpa [#allocation4 + $0x1], 1 }
 0x262   :  { %523 = vsyncpa [#allocation7], 1 }
 0x263   :  { %525 = vsyncpa [#allocation7 + $0x1], 1 }
 0x264   :  { %526 = vsyncpa [#allocation5], 1 }
 0x265   :  { %528 = vsyncpa [#allocation5 + $0x1], 1 }

</bundles_post_ra>
